<compile_context>
chip_gen: v6e
topology: v6e:2x2x1
jax: 0.10.0
libtpu: 0.0.40
codegen_flags: <defaults>
</compile_context>

<pallas_src>
import math

import jax
import jax.numpy as jnp
from jax import lax
from jax.experimental import pallas as pl
from jax.experimental.pallas import tpu as pltpu


def _recip_f32(d):
    """1/d: EUP approximate-reciprocal seed + two Newton steps on the VPU.

    EUP is the tight unit in this loop while the VPU has slack; Newton steps
    restore ~full f32 accuracy so the result matches the exact-division
    reference.  (Review item: drop to one Newton step if a bundle dump shows
    VALU becoming the binding slot after lane packing.)
    """
    r = pl.reciprocal(d, approx=True)
    r = r * (2.0 - d * r)
    r = r * (2.0 - d * r)
    return r


def make_liquid_cell_kernel(unfolding_steps: int, use_bf16_matmul: bool = False):
    # bf16 MXU operands only pay off on v5e (f32 runs as multiple bf16 passes);
    # default stays f32 so the tight tolerance check below holds.
    mxu_dtype = jnp.bfloat16 if use_bf16_matmul else jnp.float32
    # fully unroll short loops (LLO visibility); partial unroll bounds vreg
    # live ranges if unfolding_steps ever grows.
    unroll = True if unfolding_steps <= 8 else 2

    def kernel(x_ref, inp_ref, dt_ref, w_in_ref, w_rec_ref, prm_ref, out_ref):
        x0 = x_ref[...].astype(jnp.float32)          # (TB, PN) lane-dense
        dt = dt_ref[...]                             # (TB, PN), pre-scaled by 1/steps
        b = prm_ref[0:1, :]                          # (1, PN)
        a = prm_ref[1:2, :]                          # (1, PN)
        inv_tau = prm_ref[2:3, :]                    # (1, PN)  (1/tau precomputed)

        w_rec = w_rec_ref[...].astype(mxu_dtype)     # resident across steps
        # input projection + bias is loop-invariant (MXU)
        u = jnp.dot(inp_ref[...].astype(mxu_dtype),
                    w_in_ref[...].astype(mxu_dtype),
                    preferred_element_type=jnp.float32) + b      # (TB, PN)

        def step(_, x):
            z = jnp.dot(x.astype(mxu_dtype), w_rec,
                        preferred_element_type=jnp.float32) + u  # (TB, PN), MXU
            # mish(z) = z*tanh(softplus(z)) = z*p/(p+2), p = e^z*(e^z+2):
            # one EUP exp instead of exp+log+tanh.  Clamp at 20 is exact in
            # f32 (tanh(softplus(20)) == 1.0) and keeps p2-scaled num/den far
            # from f32 overflow.
            e = jnp.exp(jnp.minimum(z, 20.0))
            p = e * (e + 2.0)
            p2 = p + 2.0
            q = z * p                                            # = mish(z)*(p+2)
            # x' = (x + dt*a*f)/(1 + dt*(1/tau + f)), f = q/p2; scale num &
            # den by p2 so exactly ONE reciprocal per step remains.  Only dt
            # and u are full-tile invariant VMEM streams; a/inv_tau stay
            # (1, PN) and broadcast on use (review: relieve the vld slot).
            num = x * p2 + dt * (a * q)
            den = p2 + dt * (inv_tau * p2 + q)
            return num * _recip_f32(den)

        x = lax.fori_loop(0, unfolding_steps, step, x0, unroll=unroll)
        out_ref[...] = x.astype(out_ref.dtype)

    return kernel


def liquid_cell_forward(x_t, input_t, delta_t, w_in_t, w_rec_t, biases, a, tau,
                        unfolding_steps: int, tile_rows=None,
                        use_bf16_matmul: bool = False):
    """x_t (B,N), input_t (B,I), delta_t (B,) -> (B,N)."""
    f32 = jnp.float32
    B, N = x_t.shape
    I = input_t.shape[1]

    # ---- lane packing: make the last dim 128-dense --------------------------
    if N < 128 and 128 % N == 0:
        P = 128 // N
    else:
        P = 1  # TODO(synk): for N not dividing 128, pad N to a multiple of 128 at the call site.
    PN, PI = P * N, P * I

    rows = pl.cdiv(B, P)
    if tile_rows is None:
        # >=2 grid steps once rows > 8 (both v7x TensorCores busy + pipelining),
        # capped at 512 rows/tile.
        tile_rows = min(512, 8 * pl.cdiv(rows, 16))
    tile_rows = max(8, 8 * (tile_rows // 8))          # multiple of 8 (f32 sublane tile)
    tile_rows = min(tile_rows, 8 * pl.cdiv(rows, 8))  # don't exceed padded rows
    rows_p = tile_rows * pl.cdiv(rows, tile_rows)
    Bp = rows_p * P
    grid = (rows_p // tile_rows,)

    # ---- pad batch with zero rows (benign: dt=0 -> x'=x=0) and pack ---------
    pad_b = Bp - B
    xw = jnp.pad(x_t.astype(f32), ((0, pad_b), (0, 0)))
    iw = jnp.pad(input_t.astype(f32), ((0, pad_b), (0, 0)))
    dtw = jnp.pad(delta_t.astype(f32).reshape(-1), ((0, pad_b),))

    x_p = xw.reshape(rows_p, PN)
    inp_p = iw.reshape(rows_p, PI)
    # dt pre-scaled by 1/steps and replicated across each sample's N-lane group
    dt_p = jnp.repeat(dtw.reshape(rows_p, P) * (1.0 / unfolding_steps), N, axis=1)

    eye_p = jnp.eye(P, dtype=f32)
    w_in_p = jnp.kron(eye_p, w_in_t.astype(f32))      # (PI, PN) block-diagonal
    w_rec_p = jnp.kron(eye_p, w_rec_t.astype(f32))    # (PN, PN) block-diagonal

    # bias / a / 1/tau packed into one (8, PN) param slab -> single const DMA.
    prm = jnp.zeros((8, PN), f32)
    prm = prm.at[0].set(jnp.tile(biases.astype(f32).reshape(-1), P))
    prm = prm.at[1].set(jnp.tile(a.astype(f32).reshape(-1), P))
    prm = prm.at[2].set(jnp.tile((1.0 / tau.astype(f32)).reshape(-1), P))

    batch_map = lambda i: (i, 0)   # tiled along (packed) batch rows
    const_map = lambda i: (0, 0)   # weights/params resident across tiles

    in_specs = [
        pl.BlockSpec((tile_rows, PN), batch_map),   # x (packed)
        pl.BlockSpec((tile_rows, PI), batch_map),   # input (packed)
        pl.BlockSpec((tile_rows, PN), batch_map),   # dt (packed, pre-scaled)
        pl.BlockSpec((PI, PN), const_map),          # w_in  block-diag (resident)
        pl.BlockSpec((PN, PN), const_map),          # w_rec block-diag (resident)
        pl.BlockSpec((8, PN), const_map),           # [bias; a; 1/tau] slab
    ]
    out_specs = pl.BlockSpec((tile_rows, PN), batch_map)

    # Explicit VMEM budget: double-buffered batch tiles + (conservatively)
    # double-buffered constant-index weights; capped at 64 MiB for v7x.
    itemsize = 4
    need = (2 * itemsize * tile_rows * (3 * PN + PI)
            + 2 * itemsize * (PI * PN + PN * PN + 8 * PN))
    vmem_limit = int(min(max(2 * need, 16 << 20), 64 << 20))

    out_p = pl.pallas_call(
        make_liquid_cell_kernel(unfolding_steps, use_bf16_matmul),
        out_shape=jax.ShapeDtypeStruct((rows_p, PN), f32),
        grid=grid,
        in_specs=in_specs,
        out_specs=out_specs,
        compiler_params=pltpu.CompilerParams(
            dimension_semantics=("parallel",),   # batch tiles are independent
            vmem_limit_bytes=vmem_limit,
        ),
    )(x_p, inp_p, dt_p, w_in_p, w_rec_p, prm)

    return out_p.reshape(Bp, N)[:B]


def init_params(key, neuron_number: int, input_size: int):
    """Deterministic synthetic init matching the PyTorch module's __init__."""
    std = 0.001
    k1, k2, k3 = jax.random.split(key, 3)

    def xavier_uniform(k, fan_out, fan_in, gain):
        bound = gain * math.sqrt(6.0 / (fan_in + fan_out))
        # torch Linear weight is (out, in); we store the transpose (in, out)
        w = jax.random.uniform(k, (fan_out, fan_in), jnp.float32, -bound, bound)
        return w.T

    w_in_t = xavier_uniform(k1, neuron_number, input_size, std)      # (I, N)
    w_rec_t = xavier_uniform(k2, neuron_number, neuron_number, std)  # (N, N)
    biases = jax.random.normal(k3, (1, neuron_number), jnp.float32) * std
    a = jnp.ones((1, neuron_number), jnp.float32)
    tau = jnp.ones((1, neuron_number), jnp.float32)
    return w_in_t, w_rec_t, biases, a, tau


if __name__ == "__main__":
    B, N, I, UNFOLD = 8, 32, 16, 4

    key = jax.random.PRNGKey(0)
    kx, ki, kd, kp = jax.random.split(key, 4)

    x_t = jax.random.normal(kx, (B, N), jnp.float32)
    input_t = jax.random.normal(ki, (B, I), jnp.float32)
    delta_t = jax.random.uniform(kd, (B,), jnp.float32, 0.1, 1.0)

    w_in_t, w_rec_t, biases, a, tau = init_params(kp, N, I)

    out = liquid_cell_forward(x_t, input_t, delta_t,
                              w_in_t, w_rec_t, biases, a, tau, UNFOLD)
    jax.block_until_ready(out)

    # pure-JAX reference (exact formula: z*tanh(softplus(z)) and true division)
    def ref_forward(x, inp, dt):
        dt = dt.reshape(-1, 1) / UNFOLD
        u = inp @ w_in_t + biases
        for _ in range(UNFOLD):
            z = x @ w_rec_t + u
            f = z * jnp.tanh(jax.nn.softplus(z))
            x = (x + dt * f * a) / (1.0 + dt * (1.0 / tau + f))
        return x

    ref = ref_forward(x_t, input_t, delta_t)
    assert out.shape == (B, N)
    assert jnp.allclose(out, ref, atol=1e-4, rtol=1e-4), "mismatch vs reference"
    print("KERNEL_OK")
</pallas_src>

<mosaic_0001>
module attributes {stable_mosaic.version = 11 : i64} {
  func.func @kernel(%arg0: i32, %arg1: memref<8x128xf32, #tpu.memory_space<vmem>>, %arg2: memref<8x64xf32, #tpu.memory_space<vmem>>, %arg3: memref<8x128xf32, #tpu.memory_space<vmem>>, %arg4: memref<64x128xf32, #tpu.memory_space<vmem>>, %arg5: memref<128x128xf32, #tpu.memory_space<vmem>>, %arg6: memref<8x128xf32, #tpu.memory_space<vmem>>, %arg7: memref<8x128xf32, #tpu.memory_space<vmem>>) attributes {dimension_semantics = [#tpu.dimension_semantics<parallel>], iteration_bounds = array<i64: 1>, scalar_prefetch = 0 : i64, scratch_operands = 0 : i64, tpu.core_type = #tpu.core_type<tc>, window_params = [{transform_indices = @transform_0, window_bounds = array<i64: 8, 128>}, {transform_indices = @transform_1, window_bounds = array<i64: 8, 64>}, {transform_indices = @transform_2, window_bounds = array<i64: 8, 128>}, {pipeline_mode = #tpu.pipeline_mode<synchronous>, transform_indices = @transform_3, window_bounds = array<i64: 64, 128>}, {pipeline_mode = #tpu.pipeline_mode<synchronous>, transform_indices = @transform_4, window_bounds = array<i64: 128, 128>}, {pipeline_mode = #tpu.pipeline_mode<synchronous>, transform_indices = @transform_5, window_bounds = array<i64: 8, 128>}, {transform_indices = @transform_6, window_bounds = array<i64: 8, 128>}]} {
    %c0 = arith.constant 0 : index
    %c0_0 = arith.constant 0 : index
    %0 = vector.load %arg1[%c0, %c0_0] : memref<8x128xf32, #tpu.memory_space<vmem>>, vector<8x128xf32>
    %c0_1 = arith.constant 0 : index
    %c0_2 = arith.constant 0 : index
    %1 = vector.load %arg3[%c0_1, %c0_2] : memref<8x128xf32, #tpu.memory_space<vmem>>, vector<8x128xf32>
    %c0_3 = arith.constant 0 : index
    %c0_4 = arith.constant 0 : index
    %2 = vector.load %arg6[%c0_3, %c0_4] : memref<8x128xf32, #tpu.memory_space<vmem>>, vector<1x128xf32>
    %c1 = arith.constant 1 : index
    %c0_5 = arith.constant 0 : index
    %3 = vector.load %arg6[%c1, %c0_5] : memref<8x128xf32, #tpu.memory_space<vmem>>, vector<1x128xf32>
    %c2 = arith.constant 2 : index
    %c0_6 = arith.constant 0 : index
    %4 = vector.load %arg6[%c2, %c0_6] : memref<8x128xf32, #tpu.memory_space<vmem>>, vector<1x128xf32>
    %c0_7 = arith.constant 0 : index
    %c0_8 = arith.constant 0 : index
    %5 = vector.load %arg5[%c0_7, %c0_8] : memref<128x128xf32, #tpu.memory_space<vmem>>, vector<128x128xf32>
    %c0_9 = arith.constant 0 : index
    %c0_10 = arith.constant 0 : index
    %6 = vector.load %arg2[%c0_9, %c0_10] : memref<8x64xf32, #tpu.memory_space<vmem>>, vector<8x64xf32>
    %c0_11 = arith.constant 0 : index
    %c0_12 = arith.constant 0 : index
    %7 = vector.load %arg4[%c0_11, %c0_12] : memref<64x128xf32, #tpu.memory_space<vmem>>, vector<64x128xf32>
    %cst = arith.constant dense<0.000000e+00> : vector<8x128xf32>
    %8 = tpu.matmul %6, %7, %cst {dimension_numbers = #tpu.dot_dimension_numbers<[1], [0], [0], [1], [0, 0, 1, 1], [], []>} : vector<8x64xf32>, vector<64x128xf32>, vector<8x128xf32> -> vector<8x128xf32>
    %9 = vector.broadcast %2 : vector<1x128xf32> to vector<8x128xf32>
    %10 = arith.addf %8, %9 : vector<8x128xf32>
    %c0_i32 = arith.constant 0 : i32
    %cst_13 = arith.constant dense<0.000000e+00> : vector<8x128xf32>
    %11 = tpu.matmul %0, %5, %cst_13 {dimension_numbers = #tpu.dot_dimension_numbers<[1], [0], [0], [1], [0, 0, 1, 1], [], []>} : vector<8x128xf32>, vector<128x128xf32>, vector<8x128xf32> -> vector<8x128xf32>
    %12 = arith.addf %11, %10 : vector<8x128xf32>
    %cst_14 = arith.constant 2.000000e+01 : f32
    %13 = vector.broadcast %cst_14 : f32 to vector<8x128xf32>
    %14 = arith.minimumf %12, %13 : vector<8x128xf32>
    %15 = math.exp %14 : vector<8x128xf32>
    %cst_15 = arith.constant 2.000000e+00 : f32
    %16 = vector.broadcast %cst_15 : f32 to vector<8x128xf32>
    %17 = arith.addf %15, %16 : vector<8x128xf32>
    %18 = arith.mulf %15, %17 : vector<8x128xf32>
    %cst_16 = arith.constant 2.000000e+00 : f32
    %19 = vector.broadcast %cst_16 : f32 to vector<8x128xf32>
    %20 = arith.addf %18, %19 : vector<8x128xf32>
    %21 = arith.mulf %12, %18 : vector<8x128xf32>
    %22 = arith.mulf %0, %20 : vector<8x128xf32>
    %23 = vector.broadcast %3 : vector<1x128xf32> to vector<8x128xf32>
    %24 = arith.mulf %23, %21 : vector<8x128xf32>
    %25 = arith.mulf %1, %24 : vector<8x128xf32>
    %26 = arith.addf %22, %25 : vector<8x128xf32>
    %27 = vector.broadcast %4 : vector<1x128xf32> to vector<8x128xf32>
    %28 = arith.mulf %27, %20 : vector<8x128xf32>
    %29 = arith.addf %28, %21 : vector<8x128xf32>
    %30 = arith.mulf %1, %29 : vector<8x128xf32>
    %31 = arith.addf %20, %30 : vector<8x128xf32>
    %32 = tpu.reciprocal %31 {approx = true} : vector<8x128xf32> -> vector<8x128xf32>
    %33 = arith.mulf %31, %32 : vector<8x128xf32>
    %cst_17 = arith.constant 2.000000e+00 : f32
    %34 = vector.broadcast %cst_17 : f32 to vector<8x128xf32>
    %35 = arith.subf %34, %33 : vector<8x128xf32>
    %36 = arith.mulf %32, %35 : vector<8x128xf32>
    %37 = arith.mulf %31, %36 : vector<8x128xf32>
    %cst_18 = arith.constant 2.000000e+00 : f32
    %38 = vector.broadcast %cst_18 : f32 to vector<8x128xf32>
    %39 = arith.subf %38, %37 : vector<8x128xf32>
    %40 = arith.mulf %36, %39 : vector<8x128xf32>
    %41 = arith.mulf %26, %40 : vector<8x128xf32>
    %c1_i32 = arith.constant 1 : i32
    %cst_19 = arith.constant dense<0.000000e+00> : vector<8x128xf32>
    %42 = tpu.matmul %41, %5, %cst_19 {dimension_numbers = #tpu.dot_dimension_numbers<[1], [0], [0], [1], [0, 0, 1, 1], [], []>} : vector<8x128xf32>, vector<128x128xf32>, vector<8x128xf32> -> vector<8x128xf32>
    %43 = arith.addf %42, %10 : vector<8x128xf32>
    %cst_20 = arith.constant 2.000000e+01 : f32
    %44 = vector.broadcast %cst_20 : f32 to vector<8x128xf32>
    %45 = arith.minimumf %43, %44 : vector<8x128xf32>
    %46 = math.exp %45 : vector<8x128xf32>
    %cst_21 = arith.constant 2.000000e+00 : f32
    %47 = vector.broadcast %cst_21 : f32 to vector<8x128xf32>
    %48 = arith.addf %46, %47 : vector<8x128xf32>
    %49 = arith.mulf %46, %48 : vector<8x128xf32>
    %cst_22 = arith.constant 2.000000e+00 : f32
    %50 = vector.broadcast %cst_22 : f32 to vector<8x128xf32>
    %51 = arith.addf %49, %50 : vector<8x128xf32>
    %52 = arith.mulf %43, %49 : vector<8x128xf32>
    %53 = arith.mulf %41, %51 : vector<8x128xf32>
    %54 = vector.broadcast %3 : vector<1x128xf32> to vector<8x128xf32>
    %55 = arith.mulf %54, %52 : vector<8x128xf32>
    %56 = arith.mulf %1, %55 : vector<8x128xf32>
    %57 = arith.addf %53, %56 : vector<8x128xf32>
    %58 = vector.broadcast %4 : vector<1x128xf32> to vector<8x128xf32>
    %59 = arith.mulf %58, %51 : vector<8x128xf32>
    %60 = arith.addf %59, %52 : vector<8x128xf32>
    %61 = arith.mulf %1, %60 : vector<8x128xf32>
    %62 = arith.addf %51, %61 : vector<8x128xf32>
    %63 = tpu.reciprocal %62 {approx = true} : vector<8x128xf32> -> vector<8x128xf32>
    %64 = arith.mulf %62, %63 : vector<8x128xf32>
    %cst_23 = arith.constant 2.000000e+00 : f32
    %65 = vector.broadcast %cst_23 : f32 to vector<8x128xf32>
    %66 = arith.subf %65, %64 : vector<8x128xf32>
    %67 = arith.mulf %63, %66 : vector<8x128xf32>
    %68 = arith.mulf %62, %67 : vector<8x128xf32>
    %cst_24 = arith.constant 2.000000e+00 : f32
    %69 = vector.broadcast %cst_24 : f32 to vector<8x128xf32>
    %70 = arith.subf %69, %68 : vector<8x128xf32>
    %71 = arith.mulf %67, %70 : vector<8x128xf32>
    %72 = arith.mulf %57, %71 : vector<8x128xf32>
    %c2_i32 = arith.constant 2 : i32
    %cst_25 = arith.constant dense<0.000000e+00> : vector<8x128xf32>
    %73 = tpu.matmul %72, %5, %cst_25 {dimension_numbers = #tpu.dot_dimension_numbers<[1], [0], [0], [1], [0, 0, 1, 1], [], []>} : vector<8x128xf32>, vector<128x128xf32>, vector<8x128xf32> -> vector<8x128xf32>
    %74 = arith.addf %73, %10 : vector<8x128xf32>
    %cst_26 = arith.constant 2.000000e+01 : f32
    %75 = vector.broadcast %cst_26 : f32 to vector<8x128xf32>
    %76 = arith.minimumf %74, %75 : vector<8x128xf32>
    %77 = math.exp %76 : vector<8x128xf32>
    %cst_27 = arith.constant 2.000000e+00 : f32
    %78 = vector.broadcast %cst_27 : f32 to vector<8x128xf32>
    %79 = arith.addf %77, %78 : vector<8x128xf32>
    %80 = arith.mulf %77, %79 : vector<8x128xf32>
    %cst_28 = arith.constant 2.000000e+00 : f32
    %81 = vector.broadcast %cst_28 : f32 to vector<8x128xf32>
    %82 = arith.addf %80, %81 : vector<8x128xf32>
    %83 = arith.mulf %74, %80 : vector<8x128xf32>
    %84 = arith.mulf %72, %82 : vector<8x128xf32>
    %85 = vector.broadcast %3 : vector<1x128xf32> to vector<8x128xf32>
    %86 = arith.mulf %85, %83 : vector<8x128xf32>
    %87 = arith.mulf %1, %86 : vector<8x128xf32>
    %88 = arith.addf %84, %87 : vector<8x128xf32>
    %89 = vector.broadcast %4 : vector<1x128xf32> to vector<8x128xf32>
    %90 = arith.mulf %89, %82 : vector<8x128xf32>
    %91 = arith.addf %90, %83 : vector<8x128xf32>
    %92 = arith.mulf %1, %91 : vector<8x128xf32>
    %93 = arith.addf %82, %92 : vector<8x128xf32>
    %94 = tpu.reciprocal %93 {approx = true} : vector<8x128xf32> -> vector<8x128xf32>
    %95 = arith.mulf %93, %94 : vector<8x128xf32>
    %cst_29 = arith.constant 2.000000e+00 : f32
    %96 = vector.broadcast %cst_29 : f32 to vector<8x128xf32>
    %97 = arith.subf %96, %95 : vector<8x128xf32>
    %98 = arith.mulf %94, %97 : vector<8x128xf32>
    %99 = arith.mulf %93, %98 : vector<8x128xf32>
    %cst_30 = arith.constant 2.000000e+00 : f32
    %100 = vector.broadcast %cst_30 : f32 to vector<8x128xf32>
    %101 = arith.subf %100, %99 : vector<8x128xf32>
    %102 = arith.mulf %98, %101 : vector<8x128xf32>
    %103 = arith.mulf %88, %102 : vector<8x128xf32>
    %c3_i32 = arith.constant 3 : i32
    %cst_31 = arith.constant dense<0.000000e+00> : vector<8x128xf32>
    %104 = tpu.matmul %103, %5, %cst_31 {dimension_numbers = #tpu.dot_dimension_numbers<[1], [0], [0], [1], [0, 0, 1, 1], [], []>} : vector<8x128xf32>, vector<128x128xf32>, vector<8x128xf32> -> vector<8x128xf32>
    %105 = arith.addf %104, %10 : vector<8x128xf32>
    %cst_32 = arith.constant 2.000000e+01 : f32
    %106 = vector.broadcast %cst_32 : f32 to vector<8x128xf32>
    %107 = arith.minimumf %105, %106 : vector<8x128xf32>
    %108 = math.exp %107 : vector<8x128xf32>
    %cst_33 = arith.constant 2.000000e+00 : f32
    %109 = vector.broadcast %cst_33 : f32 to vector<8x128xf32>
    %110 = arith.addf %108, %109 : vector<8x128xf32>
    %111 = arith.mulf %108, %110 : vector<8x128xf32>
    %cst_34 = arith.constant 2.000000e+00 : f32
    %112 = vector.broadcast %cst_34 : f32 to vector<8x128xf32>
    %113 = arith.addf %111, %112 : vector<8x128xf32>
    %114 = arith.mulf %105, %111 : vector<8x128xf32>
    %115 = arith.mulf %103, %113 : vector<8x128xf32>
    %116 = vector.broadcast %3 : vector<1x128xf32> to vector<8x128xf32>
    %117 = arith.mulf %116, %114 : vector<8x128xf32>
    %118 = arith.mulf %1, %117 : vector<8x128xf32>
    %119 = arith.addf %115, %118 : vector<8x128xf32>
    %120 = vector.broadcast %4 : vector<1x128xf32> to vector<8x128xf32>
    %121 = arith.mulf %120, %113 : vector<8x128xf32>
    %122 = arith.addf %121, %114 : vector<8x128xf32>
    %123 = arith.mulf %1, %122 : vector<8x128xf32>
    %124 = arith.addf %113, %123 : vector<8x128xf32>
    %125 = tpu.reciprocal %124 {approx = true} : vector<8x128xf32> -> vector<8x128xf32>
    %126 = arith.mulf %124, %125 : vector<8x128xf32>
    %cst_35 = arith.constant 2.000000e+00 : f32
    %127 = vector.broadcast %cst_35 : f32 to vector<8x128xf32>
    %128 = arith.subf %127, %126 : vector<8x128xf32>
    %129 = arith.mulf %125, %128 : vector<8x128xf32>
    %130 = arith.mulf %124, %129 : vector<8x128xf32>
    %cst_36 = arith.constant 2.000000e+00 : f32
    %131 = vector.broadcast %cst_36 : f32 to vector<8x128xf32>
    %132 = arith.subf %131, %130 : vector<8x128xf32>
    %133 = arith.mulf %129, %132 : vector<8x128xf32>
    %134 = arith.mulf %119, %133 : vector<8x128xf32>
    %c0_37 = arith.constant 0 : index
    %c0_38 = arith.constant 0 : index
    %135 = vector.load %arg7[%c0_37, %c0_38] : memref<8x128xf32, #tpu.memory_space<vmem>>, vector<8x128xf32>
    tpu.vector_store %arg7[%c0_37, %c0_38], %134 {strides = array<i32>} : memref<8x128xf32, #tpu.memory_space<vmem>>, vector<8x128xf32>,
    return
  }
  func.func @transform_0(%arg0: i32) -> (i32, i32) {
    %c0_i32 = arith.constant 0 : i32
    %c0_i32_0 = arith.constant 0 : i32
    return %arg0, %c0_i32 : i32, i32
  }
  func.func @transform_1(%arg0: i32) -> (i32, i32) {
    %c0_i32 = arith.constant 0 : i32
    %c0_i32_0 = arith.constant 0 : i32
    return %arg0, %c0_i32 : i32, i32
  }
  func.func @transform_2(%arg0: i32) -> (i32, i32) {
    %c0_i32 = arith.constant 0 : i32
    %c0_i32_0 = arith.constant 0 : i32
    return %arg0, %c0_i32 : i32, i32
  }
  func.func @transform_3(%arg0: i32) -> (i32, i32) {
    %c0_i32 = arith.constant 0 : i32
    %c0_i32_0 = arith.constant 0 : i32
    %c0_i32_1 = arith.constant 0 : i32
    return %c0_i32, %c0_i32_0 : i32, i32
  }
  func.func @transform_4(%arg0: i32) -> (i32, i32) {
    %c0_i32 = arith.constant 0 : i32
    %c0_i32_0 = arith.constant 0 : i32
    %c0_i32_1 = arith.constant 0 : i32
    return %c0_i32, %c0_i32_0 : i32, i32
  }
  func.func @transform_5(%arg0: i32) -> (i32, i32) {
    %c0_i32 = arith.constant 0 : i32
    %c0_i32_0 = arith.constant 0 : i32
    %c0_i32_1 = arith.constant 0 : i32
    return %c0_i32, %c0_i32_0 : i32, i32
  }
  func.func @transform_6(%arg0: i32) -> (i32, i32) {
    %c0_i32 = arith.constant 0 : i32
    %c0_i32_0 = arith.constant 0 : i32
    return %arg0, %c0_i32 : i32, i32
  }
}

</mosaic_0001>

<bundles_post_ra>
// kernel: tpu_custom_call.1
= control target key start
LH: loop header
LB: loop body
LE: loop exit
PB: predicated region body
PF: predicated region fallthrough
CT: control target
= control target key end

     0   :  { %11 = vsyncpa [#allocation3], 0  ;;  %s1274_s0 = inlined_call_operand.hbm [shape: f32[8,128], index: 0, kind: input, shape index: {}]   ;;  %s1275_s1 = inlined_call_operand.hbm [shape: f32[8,64], index: 1, kind: input, shape index: {}]   ;;  %s1276_s2 = inlined_call_operand.hbm [shape: f32[8,128], index: 2, kind: input, shape index: {}]   ;;  %s1277_s3 = inlined_call_operand.hbm [shape: f32[64,128], index: 3, kind: input, shape index: {}]   ;;  %s1278_s4 = inlined_call_operand.hbm [shape: f32[128,128], index: 4, kind: input, shape index: {}]   ;;  %s1279_s5 = inlined_call_operand.vmem [shape: f32[8,128], index: 5, kind: input, shape index: {}]   ;;  %s1280_s6 = inlined_call_operand.hbm [shape: f32[8,128], index: 6, kind: output, shape index: {}]  }
   0x1   :  { %12 = vsyncpa [#allocation6], 0 }
   0x2   :  { %13 = vsyncpa [#allocation9], 0 }
   0x3   :  { %14 = vsyncpa [#allocation4], 0  ;;  %s986_s21 = smov [#allocation5]   ;;  %s987_s23 = smov [#allocation8]  }
   0x4   :  { %s31_s22 = sshll.u32 %s986_s21, 4  ;;  %s50_s24 = sshll.u32 %s987_s23, 4  ;;  %s32_s22 = int_to_ptr.vmem [resolvable:$true] %s31_s22  ;;  %s51_s24 = int_to_ptr.vmem [resolvable:$true] %s50_s24 }
   0x5   :  { %s866_s25 = scalar_lea.vmem %s32_s22, 128  ;;  %p871_p1 = scmp.lt.s32.totalorder %s32_s22, %s32_s22 }
   0x6   :  { %p867_p0 = scmp.ne.s32.totalorder %s32_s22, %s866_s25  ;;  %p872_p2 = scmp.lt.s32.totalorder %s866_s25, %s866_s25 }
   0x8   :  { %p873_p3 = por %p872_p2, %p871_p1 }
   0xa   :  { %p874_p4 = pnand %p873_p3, %p867_p0 }
   0xc   :  { %877 = shalt.err (!%p874_p4)
}
   0xd   :  { %34 = dma.hbm_to_vmem [thread:$0]  %s1275_s1, 128, %s32_s22, [#allocation6]  }
   0xe   :  { %s886_s28 = scalar_lea.vmem %s51_s24, 1024  ;;  %p891_p6 = scmp.lt.s32.totalorder %s51_s24, %s51_s24 }
   0xf   :  { %p887_p5 = scmp.ne.s32.totalorder %s51_s24, %s886_s28  ;;  %p892_p7 = scmp.lt.s32.totalorder %s886_s28, %s886_s28 }
  0x11   :  { %p893_p8 = por %p892_p7, %p891_p6 }
  0x13   :  { %p894_p9 = pnand %p893_p8, %p887_p5 }
  0x15   :  { %897 = shalt.err (!%p894_p9)
}
  0x16   :  { %s988_s29 = smov 128   ;;  %s989_s30 = smov 8  }
  0x17   :  { %56 = dma.hbm_to_vmem [thread:$0]  %s1277_s3, 1024, %s51_s24, [#allocation9], %s988_s29, %s988_s29, %s989_s30  }
  0x18   :  { %s990_s9 = smov [#allocation2]   ;;  %s991_s11 = smov [#allocation7]  }
  0x19   :  { %s21_s10 = sshll.u32 %s990_s9, 4  ;;  %s41_s1 = sshll.u32 %s991_s11, 4  ;;  %s22_s10 = int_to_ptr.vmem [resolvable:$true] %s21_s10  ;;  %s42_s1 = int_to_ptr.vmem [resolvable:$true] %s41_s1 }
  0x1a   :  { %s906_s12 = scalar_lea.vmem %s22_s10, 128  ;;  %p911_p11 = scmp.lt.s32.totalorder %s22_s10, %s22_s10 }
  0x1b   :  { %p907_p10 = scmp.ne.s32.totalorder %s22_s10, %s906_s12  ;;  %p912_p12 = scmp.lt.s32.totalorder %s906_s12, %s906_s12 }
  0x1d   :  { %p913_p13 = por %p912_p12, %p911_p11 }
  0x1f   :  { %p914_p0 = pnand %p913_p13, %p907_p10 }
  0x21   :  { %917 = shalt.err (!%p914_p0)
}
  0x22   :  { %24 = dma.hbm_to_vmem [thread:$0]  %s1274_s0, 128, %s22_s10, [#allocation3]  }
  0x23   :  { %s926_s15 = scalar_lea.vmem %s42_s1, 128  ;;  %p931_p2 = scmp.lt.s32.totalorder %s42_s1, %s42_s1 }
  0x24   :  { %p927_p1 = scmp.ne.s32.totalorder %s42_s1, %s926_s15  ;;  %p932_p3 = scmp.lt.s32.totalorder %s926_s15, %s926_s15 }
  0x26   :  { %p933_p4 = por %p932_p3, %p931_p2 }
  0x28   :  { %p934_p5 = pnand %p933_p4, %p927_p1 }
  0x2a   :  { %937 = shalt.err (!%p934_p5)
}
  0x2b   :  { %44 = dma.hbm_to_vmem [thread:$0]  %s1276_s2, 128, %s42_s1, [#allocation6]  }
  0x2c   :  { %s992_s17 = smov [#allocation10]  }
  0x2d   :  { %s62_s18 = sshll.u32 %s992_s17, 4  ;;  %s63_s18 = int_to_ptr.vmem [resolvable:$true] %s62_s18 }
  0x2e   :  { %s946_s19 = scalar_lea.vmem %s63_s18, 2048  ;;  %p951_p7 = scmp.lt.s32.totalorder %s63_s18, %s63_s18 }
  0x2f   :  { %p947_p6 = scmp.ne.s32.totalorder %s63_s18, %s946_s19  ;;  %p952_p8 = scmp.lt.s32.totalorder %s946_s19, %s946_s19 }
  0x31   :  { %p953_p9 = por %p952_p8, %p951_p7 }
  0x33   :  { %p954_p10 = pnand %p953_p9, %p947_p6 }
  0x35   :  { %957 = shalt.err (!%p954_p10)
}
  0x36   :  { %68 = dma.hbm_to_vmem [thread:$0]  %s1278_s4, 2048, %s63_s18, [#allocation9], %s988_s29, %s988_s29, %s989_s30  }
  0x37   :  { %978 = dma.done.wait [#allocation3], 128  }
  0x38   :  { %979 = vsyncadd [#allocation3], 4294967168 }
  0x39   :  { %980 = dma.done.wait [#allocation6], 256  }
  0x3a   :  { %981 = vsyncadd [#allocation6], 4294967040 }
  0x3b   :  { %982 = dma.done.wait [#allocation9], 3072  }
  0x3c   :  { %983 = vsyncadd [#allocation9], 4294964224  ;;  %v993_v0 = vmov 0.0   ;;  %vm994_vm0 = vmmov 0   ;;  %v1058_v1 = vld [vmem:[#allocation10 + $0x78] sm:$0xff]  ;;  %v1060_v2 = vld [vmem:[#allocation10 + $0x70] sm:$0xff] }
  0x3d   :  { %692 = vmatprep.subr.mxu1 %v993_v0  ;;  %673 = vmatprep.subr.mxu0 %v993_v0  ;;  %v1064_v3 = vld [vmem:[#allocation10 + $0x68] sm:$0xff]  ;;  %v115_v4 = vld [vmem:[#allocation8 + $0x38] sm:$0xff]  ;;  %v114_v5 = vld [vmem:[#allocation8 + $0x30] sm:$0xff]  ;;  %vm120_vm1 = vcmask 523264  }
  0x3e   :  { %689 = vmatprep.mubr.msk.f32.mxu0 %vm994_vm0, %v993_v0  ;;  %724 = vmatprep.mubr.msk.f32.mxu1 %vm994_vm0, %v993_v0  ;;  %v1068_v6 = vld [vmem:[#allocation10 + $0x60] sm:$0xff]  ;;  %v113_v7 = vld [vmem:[#allocation8 + $0x28] sm:$0xff]  ;;  %v1073_v8 = vld [vmem:[#allocation10 + $0x58] sm:$0xff] }
  0x3f   :  { %693 = vmatpush3.msra.mxu1 %v1058_v1  ;;  %674 = vmatpush3.msra.mxu0 %v115_v4  ;;  %v112_v9 = vld [vmem:[#allocation8 + $0x20] sm:$0xff]  ;;  %v1078_v10 = vld [vmem:[#allocation10 + $0x50] sm:$0xff]  ;;  %v111_v11 = vld [vmem:[#allocation8 + $0x18] sm:$0xff] }
  0x40   :  { %694 = vmatprep.subr.mxu1 %v993_v0  ;;  %675 = vmatprep.subr.mxu0 %v993_v0  ;;  %v1083_v12 = vld [vmem:[#allocation10 + $0x48] sm:$0xff]  ;;  %v110_v13 = vld [vmem:[#allocation8 + $0x10] sm:$0xff]  ;;  %v1088_v14 = vld [vmem:[#allocation10 + $0x40] sm:$0xff] }
  0x41   :  { %695 = vmatpush3.msra.mxu1 %v1060_v2  ;;  %676 = vmatpush3.msra.mxu0 %v114_v5  ;;  %v109_v15 = vld [vmem:[#allocation8 + $0x8] sm:$0xff]  ;;  %v1093_v16 = vld [vmem:[#allocation10 + $0x38] sm:$0xff]  ;;  %v108_v17 = vld [vmem:[#allocation8] sm:$0xff] }
  0x42   :  { %696 = vmatprep.subr.mxu1 %v993_v0  ;;  %677 = vmatprep.subr.mxu0 %v993_v0  ;;  %v107_v18 = vld [vmem:[#allocation5] sm:$0xff]  ;;  %v1103_v20 = vld [vmem:[#allocation10 + $0x28] sm:$0xff]  ;;  %v1108_v21 = vld [vmem:[#allocation10 + $0x20] sm:$0xff] }
  0x43   :  { %697 = vmatpush3.msra.mxu1 %v1064_v3  ;;  %678 = vmatpush3.msra.mxu0 %v113_v7  ;;  %v1098_v19 = vld [vmem:[#allocation10 + $0x30] sm:$0xff]  ;;  %v1114_v22 = vld [vmem:[#allocation10 + $0x18] sm:$0xff]  ;;  %v1126_v24 = vld [vmem:[#allocation10 + $0x8] sm:$0xff] }
  0x44   :  { %698 = vmatprep.subr.mxu1 %v993_v0  ;;  %679 = vmatprep.subr.mxu0 %v993_v0  ;;  %v1120_v23 = vld [vmem:[#allocation10 + $0x10] sm:$0xff]  ;;  %v1132_v25 = vld [vmem:[#allocation10] sm:$0xff]  ;;  %v1136_v26 = vld [vmem:[#allocation2] sm:$0xff] }
  0x45   :  { %699 = vmatpush3.msra.mxu1 %v1068_v6  ;;  %680 = vmatpush3.msra.mxu0 %v112_v9  ;;  %v592_v29 = vld [vmem:[%s1279_s5] ss:$0 sm:$0xff]  ;;  %v1209_v39 = vld [vmem:[%s1279_s5 + $0x2] ss:$0 sm:$0xff]  ;;  %v1212_v44 = vld [vmem:[#allocation7] sm:$0xff] }
  0x46   :  { %700 = vmatprep.subr.mxu1 %v993_v0  ;;  %681 = vmatprep.subr.mxu0 %v993_v0  ;;  %v1218_v48 = vld [vmem:[%s1279_s5 + $0x1] ss:$0 sm:$0xff]  ;;  %s995_s5 = smov [#allocation11]  }
  0x47   :  { %701 = vmatpush3.msra.mxu1 %v1073_v8  ;;  %682 = vmatpush3.msra.mxu0 %v111_v11  ;;  %s581_s25 = sshll.u32 %s995_s5, 4  ;;  %s582_s25 = int_to_ptr.vmem [resolvable:$true] %s581_s25 }
  0x48   :  { %702 = vmatprep.subr.mxu1 %v993_v0  ;;  %683 = vmatprep.subr.mxu0 %v993_v0  ;;  %s958_s26 = scalar_lea.vmem %s582_s25, 128  ;;  %p963_p12 = scmp.lt.s32.totalorder %s582_s25, %s582_s25 }
  0x49   :  { %703 = vmatpush3.msra.mxu1 %v1078_v10  ;;  %684 = vmatpush3.msra.mxu0 %v110_v13  ;;  %p959_p11 = scmp.ne.s32.totalorder %s582_s25, %s958_s26  ;;  %p964_p13 = scmp.lt.s32.totalorder %s958_s26, %s958_s26 }
  0x4a   :  { %704 = vmatprep.subr.mxu1 %v993_v0  ;;  %685 = vmatprep.subr.mxu0 %v993_v0 }
  0x4b   :  { %705 = vmatpush3.msra.mxu1 %v1083_v12  ;;  %686 = vmatpush3.msra.mxu0 %v109_v15  ;;  %p965_p0 = por %p964_p13, %p963_p12 }
  0x4c   :  { %706 = vmatprep.subr.mxu1 %v993_v0  ;;  %687 = vmatprep.subr.mxu0 %v993_v0 }
  0x4d   :  { %707 = vmatpush3.msra.mxu1 %v1088_v14  ;;  %688 = vmatpush3.msra.mxu0 %v108_v17  ;;  %p966_p1 = pnand %p965_p0, %p959_p11 }
  0x4e   :  { %708 = vmatprep.subr.mxu1 %v993_v0  ;;  %690 = vmatmul.mubr.msk.f32.vlgmr.msra.gmra.mxu0 %vm120_vm1, %v107_v18 }
  0x4f   :  { %709 = vmatpush3.msra.mxu1 %v1093_v16  ;;  %727 = vmatprep.subr.mxu0 %v993_v0 }
  0x50   :  { %710 = vmatprep.subr.mxu1 %v993_v0  ;;  %728 = vmatpush3.msra.mxu0 %v1058_v1 }
  0x51   :  { %711 = vmatpush3.msra.mxu1 %v1098_v19  ;;  %729 = vmatprep.subr.mxu0 %v993_v0 }
  0x52   :  { %712 = vmatprep.subr.mxu1 %v993_v0  ;;  %730 = vmatpush3.msra.mxu0 %v1060_v2 }
  0x53   :  { %713 = vmatpush3.msra.mxu1 %v1103_v20  ;;  %731 = vmatprep.subr.mxu0 %v993_v0 }
  0x54   :  { %714 = vmatprep.subr.mxu1 %v993_v0  ;;  %732 = vmatpush3.msra.mxu0 %v1064_v3 }
  0x55   :  { %715 = vmatpush3.msra.mxu1 %v1108_v21  ;;  %733 = vmatprep.subr.mxu0 %v993_v0 }
  0x56   :  { %716 = vmatprep.subr.mxu1 %v993_v0  ;;  %734 = vmatpush3.msra.mxu0 %v1068_v6 }
  0x57   :  { %717 = vmatpush3.msra.mxu1 %v1114_v22  ;;  %735 = vmatprep.subr.mxu0 %v993_v0 }
  0x58   :  { %718 = vmatprep.subr.mxu1 %v993_v0  ;;  %736 = vmatpush3.msra.mxu0 %v1073_v8 }
  0x59   :  { %719 = vmatpush3.msra.mxu1 %v1120_v23  ;;  %737 = vmatprep.subr.mxu0 %v993_v0 }
  0x5a   :  { %720 = vmatprep.subr.mxu1 %v993_v0  ;;  %738 = vmatpush3.msra.mxu0 %v1078_v10 }
  0x5b   :  { %721 = vmatpush3.msra.mxu1 %v1126_v24  ;;  %739 = vmatprep.subr.mxu0 %v993_v0 }
  0x5c   :  { %722 = vmatprep.subr.mxu1 %v993_v0  ;;  %740 = vmatpush3.msra.mxu0 %v1083_v12 }
  0x5d   :  { %723 = vmatpush3.msra.mxu1 %v1132_v25  ;;  %741 = vmatprep.subr.mxu0 %v993_v0 }
  0x5e   :  { %725 = vmatmul.mubr.f32.vlgmr.msra.gmra.mxu1 %v1136_v26  ;;  %759 = vmatprep.mubr.msk.f32.mxu0 %vm994_vm0, %v993_v0 }
  0x5f   :  { %742 = vmatpush3.msra.mxu0 %v1088_v14  ;;  %762 = vmatprep.subr.mxu1 %v993_v0 }
  0x60   :  { %743 = vmatprep.subr.mxu0 %v993_v0  ;;  %763 = vmatpush3.msra.mxu1 %v1058_v1 }
  0x61   :  { %744 = vmatpush3.msra.mxu0 %v1093_v16  ;;  %764 = vmatprep.subr.mxu1 %v993_v0 }
  0x62   :  { %745 = vmatprep.subr.mxu0 %v993_v0  ;;  %765 = vmatpush3.msra.mxu1 %v1060_v2 }
  0x63   :  { %746 = vmatpush3.msra.mxu0 %v1098_v19  ;;  %766 = vmatprep.subr.mxu1 %v993_v0 }
  0x64   :  { %747 = vmatprep.subr.mxu0 %v993_v0  ;;  %767 = vmatpush3.msra.mxu1 %v1064_v3 }
  0x65   :  { %748 = vmatpush3.msra.mxu0 %v1103_v20  ;;  %768 = vmatprep.subr.mxu1 %v993_v0 }
  0x66   :  { %749 = vmatprep.subr.mxu0 %v993_v0  ;;  %769 = vmatpush3.msra.mxu1 %v1068_v6 }
  0x67   :  { %750 = vmatpush3.msra.mxu0 %v1108_v21  ;;  %770 = vmatprep.subr.mxu1 %v993_v0 }
  0x68   :  { %751 = vmatprep.subr.mxu0 %v993_v0  ;;  %771 = vmatpush3.msra.mxu1 %v1073_v8 }
  0x69   :  { %752 = vmatpush3.msra.mxu0 %v1114_v22  ;;  %772 = vmatprep.subr.mxu1 %v993_v0 }
  0x6a   :  { %753 = vmatprep.subr.mxu0 %v993_v0  ;;  %773 = vmatpush3.msra.mxu1 %v1078_v10 }
  0x6b   :  { %754 = vmatpush3.msra.mxu0 %v1120_v23  ;;  %774 = vmatprep.subr.mxu1 %v993_v0 }
  0x6c   :  { %755 = vmatprep.subr.mxu0 %v993_v0  ;;  %775 = vmatpush3.msra.mxu1 %v1083_v12 }
  0x6d   :  { %756 = vmatpush3.msra.mxu0 %v1126_v24  ;;  %776 = vmatprep.subr.mxu1 %v993_v0 }
  0x6e   :  { %757 = vmatprep.subr.mxu0 %v993_v0  ;;  %777 = vmatpush3.msra.mxu1 %v1088_v14 }
  0x6f   :  { %758 = vmatpush3.msra.mxu0 %v1132_v25  ;;  %778 = vmatprep.subr.mxu1 %v993_v0 }
  0x70   :  { %779 = vmatpush3.msra.mxu1 %v1093_v16  ;;  %794 = vmatprep.mubr.msk.f32.mxu1 %vm994_vm0, %v993_v0 }
  0x71   :  { %780 = vmatprep.subr.mxu1 %v993_v0  ;;  %797 = vmatprep.subr.mxu0 %v993_v0 }
  0x72   :  { %781 = vmatpush3.msra.mxu1 %v1098_v19 }
  0x73   :  { %782 = vmatprep.subr.mxu1 %v993_v0 }
  0x74   :  { %783 = vmatpush3.msra.mxu1 %v1103_v20 }
  0x75   :  { %784 = vmatprep.subr.mxu1 %v993_v0 }
  0x76   :  { %785 = vmatpush3.msra.mxu1 %v1108_v21 }
  0x77   :  { %786 = vmatprep.subr.mxu1 %v993_v0 }
  0x78   :  { %787 = vmatpush3.msra.mxu1 %v1114_v22 }
  0x79   :  { %788 = vmatprep.subr.mxu1 %v993_v0 }
  0x7a   :  { %789 = vmatpush3.msra.mxu1 %v1120_v23 }
  0x7b   :  { %790 = vmatprep.subr.mxu1 %v993_v0 }
  0x7c   :  { %791 = vmatpush3.msra.mxu1 %v1126_v24 }
  0x7d   :  { %792 = vmatprep.subr.mxu1 %v993_v0 }
  0x7e   :  { %793 = vmatpush3.msra.mxu1 %v1132_v25 }
 0x10e   :  { %v190_v27 = vpop.f32.mrf.mxu0 }
 0x10f   :  { %v1203_v30 = vadd.f32 %v592_v29, %v190_v27 }
 0x110   :  { %v691_v28 = vpop.f32.mrf.mxu0 }
 0x11e   :  { %v260_v31 = vpop.f32.mrf.mxu1 }
 0x11f   :  { %v261_v32 = vadd.f32 %v260_v31, %v1203_v30 }
 0x120   :  { %v726_v33 = vpop.f32.mrf.mxu1 }
 0x121   :  { %v264_v34 = vmin.f32 %v261_v32, 20.0 }
 0x123   :  { %v265_v35 = vmul.f32 1.442695, %v264_v34 }
 0x125   :  { %842 = vpow2.f32 %v265_v35 }
 0x132   :  { %v843_v36 = vpop.eup %842 }
 0x133   :  { %v267_v37 = vadd.f32 2.0, %v843_v36 }
 0x135   :  { %v268_v38 = vmul.f32 %v843_v36, %v267_v37 }
 0x137   :  { %v269_v40 = vadd.f32 2.0, %v268_v38  ;;  %v270_v41 = vmul.f32 %v268_v38, %v261_v32 }
 0x139   :  { %v283_v42 = vmul.f32 %v1209_v39, %v269_v40  ;;  %v276_v50 = vmul.f32 %v1218_v48, %v270_v41  ;;  %v271_v55 = vmul.f32 %v269_v40, %v1136_v26 }
 0x13b   :  { %v284_v43 = vadd.f32 %v283_v42, %v270_v41  ;;  %v277_v53 = vmul.f32 %v276_v50, %v1212_v44 }
 0x13d   :  { %v285_v45 = vmul.f32 %v284_v43, %v1212_v44  ;;  %v278_v57 = vadd.f32 %v277_v53, %v271_v55 }
 0x13f   :  { %v286_v46 = vadd.f32 %v285_v45, %v269_v40 }
 0x141   :  { %844 = vrcp.f32 %v286_v46 }
 0x14e   :  { %v845_v47 = vpop.eup %844 }
 0x14f   :  { %v288_v49 = vmul.f32 %v845_v47, %v286_v46 }
 0x151   :  { %v289_v51 = vsub.f32 2.0, %v288_v49 }
 0x153   :  { %v290_v52 = vmul.f32 %v845_v47, %v289_v51 }
 0x155   :  { %v291_v54 = vmul.f32 %v290_v52, %v286_v46 }
 0x157   :  { %v292_v56 = vsub.f32 2.0, %v291_v54 }
 0x159   :  { %v293_v58 = vmul.f32 %v292_v56, %v290_v52 }
 0x15b   :  { %v294_v59 = vmul.f32 %v293_v58, %v278_v57 }
 0x15d   :  { %760 = vmatmul.mubr.f32.vlgmr.msra.gmra.mxu0 %v294_v59 }
 0x15e   :  { %798 = vmatpush3.msra.mxu0 %v1058_v1  ;;  %829 = vmatprep.mubr.msk.f32.mxu0 %vm994_vm0, %v993_v0 }
 0x15f   :  { %799 = vmatprep.subr.mxu0 %v993_v0 }
 0x160   :  { %800 = vmatpush3.msra.mxu0 %v1060_v2 }
 0x161   :  { %801 = vmatprep.subr.mxu0 %v993_v0 }
 0x162   :  { %802 = vmatpush3.msra.mxu0 %v1064_v3 }
 0x163   :  { %803 = vmatprep.subr.mxu0 %v993_v0 }
 0x164   :  { %804 = vmatpush3.msra.mxu0 %v1068_v6 }
 0x165   :  { %805 = vmatprep.subr.mxu0 %v993_v0 }
 0x166   :  { %806 = vmatpush3.msra.mxu0 %v1073_v8 }
 0x167   :  { %807 = vmatprep.subr.mxu0 %v993_v0 }
 0x168   :  { %808 = vmatpush3.msra.mxu0 %v1078_v10 }
 0x169   :  { %809 = vmatprep.subr.mxu0 %v993_v0 }
 0x16a   :  { %810 = vmatpush3.msra.mxu0 %v1083_v12 }
 0x16b   :  { %811 = vmatprep.subr.mxu0 %v993_v0 }
 0x16c   :  { %812 = vmatpush3.msra.mxu0 %v1088_v14 }
 0x16d   :  { %813 = vmatprep.subr.mxu0 %v993_v0 }
 0x16e   :  { %814 = vmatpush3.msra.mxu0 %v1093_v16 }
 0x16f   :  { %815 = vmatprep.subr.mxu0 %v993_v0 }
 0x170   :  { %816 = vmatpush3.msra.mxu0 %v1098_v19 }
 0x171   :  { %817 = vmatprep.subr.mxu0 %v993_v0 }
 0x172   :  { %818 = vmatpush3.msra.mxu0 %v1103_v20 }
 0x173   :  { %819 = vmatprep.subr.mxu0 %v993_v0 }
 0x174   :  { %820 = vmatpush3.msra.mxu0 %v1108_v21 }
 0x175   :  { %821 = vmatprep.subr.mxu0 %v993_v0 }
 0x176   :  { %822 = vmatpush3.msra.mxu0 %v1114_v22 }
 0x177   :  { %823 = vmatprep.subr.mxu0 %v993_v0 }
 0x178   :  { %824 = vmatpush3.msra.mxu0 %v1120_v23 }
 0x179   :  { %825 = vmatprep.subr.mxu0 %v993_v0 }
 0x17a   :  { %826 = vmatpush3.msra.mxu0 %v1126_v24 }
 0x17b   :  { %827 = vmatprep.subr.mxu0 %v993_v0 }
 0x17c   :  { %828 = vmatpush3.msra.mxu0 %v1132_v25 }
 0x21d   :  { %v361_v60 = vpop.f32.mrf.mxu0 }
 0x21e   :  { %v362_v61 = vadd.f32 %v361_v60, %v1203_v30 }
 0x21f   :  { %v761_v62 = vpop.f32.mrf.mxu0 }
 0x220   :  { %v365_v63 = vmin.f32 %v362_v61, 20.0 }
 0x222   :  { %v366_v1 = vmul.f32 1.442695, %v365_v63 }
 0x224   :  { %846 = vpow2.f32 %v366_v1 }
 0x231   :  { %v847_v2 = vpop.eup %846 }
 0x232   :  { %v368_v3 = vadd.f32 2.0, %v847_v2 }
 0x234   :  { %v369_v4 = vmul.f32 %v847_v2, %v368_v3 }
 0x236   :  { %v370_v5 = vadd.f32 2.0, %v369_v4  ;;  %v371_v6 = vmul.f32 %v369_v4, %v362_v61 }
 0x238   :  { %v376_v7 = vmul.f32 %v1209_v39, %v370_v5  ;;  %v373_v12 = vmul.f32 %v1218_v48, %v371_v6  ;;  %v372_v17 = vmul.f32 %v370_v5, %v294_v59 }
 0x23a   :  { %v377_v8 = vadd.f32 %v376_v7, %v371_v6  ;;  %v374_v15 = vmul.f32 %v373_v12, %v1212_v44 }
 0x23c   :  { %v378_v9 = vmul.f32 %v377_v8, %v1212_v44  ;;  %v375_v19 = vadd.f32 %v374_v15, %v372_v17 }
 0x23e   :  { %v379_v0 = vadd.f32 %v378_v9, %v370_v5 }
 0x240   :  { %848 = vrcp.f32 %v379_v0 }
 0x24d   :  { %v849_v10 = vpop.eup %848 }
 0x24e   :  { %v381_v11 = vmul.f32 %v849_v10, %v379_v0 }
 0x250   :  { %v382_v13 = vsub.f32 2.0, %v381_v11 }
 0x252   :  { %v383_v14 = vmul.f32 %v849_v10, %v382_v13 }
 0x254   :  { %v384_v16 = vmul.f32 %v383_v14, %v379_v0 }
 0x256   :  { %v385_v18 = vsub.f32 2.0, %v384_v16 }
 0x258   :  { %v386_v20 = vmul.f32 %v385_v18, %v383_v14 }
 0x25a   :  { %v387_v21 = vmul.f32 %v386_v20, %v375_v19 }
 0x25c   :  { %795 = vmatmul.mubr.f32.vlgmr.msra.gmra.mxu1 %v387_v21 }
 0x31c   :  { %v454_v22 = vpop.f32.mrf.mxu1 }
 0x31d   :  { %v455_v23 = vadd.f32 %v454_v22, %v1203_v30 }
 0x31e   :  { %v796_v24 = vpop.f32.mrf.mxu1 }
 0x31f   :  { %v458_v25 = vmin.f32 %v455_v23, 20.0 }
 0x321   :  { %v459_v26 = vmul.f32 1.442695, %v458_v25 }
 0x323   :  { %850 = vpow2.f32 %v459_v26 }
 0x330   :  { %v851_v27 = vpop.eup %850 }
 0x331   :  { %v461_v28 = vadd.f32 2.0, %v851_v27 }
 0x333   :  { %v462_v29 = vmul.f32 %v851_v27, %v461_v28 }
 0x335   :  { %v463_v31 = vadd.f32 2.0, %v462_v29  ;;  %v464_v32 = vmul.f32 %v462_v29, %v455_v23 }
 0x337   :  { %v469_v33 = vmul.f32 %v1209_v39, %v463_v31  ;;  %v466_v40 = vmul.f32 %v1218_v48, %v464_v32  ;;  %v465_v46 = vmul.f32 %v463_v31, %v387_v21 }
 0x339   :  { %v470_v34 = vadd.f32 %v469_v33, %v464_v32  ;;  %v467_v43 = vmul.f32 %v466_v40, %v1212_v44 }
 0x33b   :  { %v471_v35 = vmul.f32 %v470_v34, %v1212_v44  ;;  %v468_v49 = vadd.f32 %v467_v43, %v465_v46 }
 0x33d   :  { %v472_v36 = vadd.f32 %v471_v35, %v463_v31 }
 0x33f   :  { %852 = vrcp.f32 %v472_v36 }
 0x34c   :  { %v853_v37 = vpop.eup %852 }
 0x34d   :  { %v474_v38 = vmul.f32 %v853_v37, %v472_v36 }
 0x34f   :  { %v475_v41 = vsub.f32 2.0, %v474_v38 }
 0x351   :  { %v476_v42 = vmul.f32 %v853_v37, %v475_v41 }
 0x353   :  { %v477_v45 = vmul.f32 %v476_v42, %v472_v36 }
 0x355   :  { %v478_v47 = vsub.f32 2.0, %v477_v45 }
 0x357   :  { %v479_v50 = vmul.f32 %v478_v47, %v476_v42 }
 0x359   :  { %v480_v51 = vmul.f32 %v479_v50, %v468_v49 }
 0x35b   :  { %830 = vmatmul.mubr.f32.vlgmr.msra.gmra.mxu0 %v480_v51 }
 0x41b   :  { %v547_v52 = vpop.f32.mrf.mxu0 }
 0x41c   :  { %v548_v53 = vadd.f32 %v547_v52, %v1203_v30 }
 0x41d   :  { %v831_v54 = vpop.f32.mrf.mxu0 }
 0x41e   :  { %v551_v55 = vmin.f32 %v548_v53, 20.0 }
 0x420   :  { %v552_v56 = vmul.f32 1.442695, %v551_v55 }
 0x422   :  { %854 = vpow2.f32 %v552_v56 }
 0x42f   :  { %v855_v57 = vpop.eup %854 }
 0x430   :  { %v554_v58 = vadd.f32 2.0, %v855_v57 }
 0x432   :  { %v555_v59 = vmul.f32 %v855_v57, %v554_v58 }
 0x434   :  { %v556_v60 = vadd.f32 2.0, %v555_v59  ;;  %v557_v61 = vmul.f32 %v555_v59, %v548_v53 }
 0x436   :  { %v562_v62 = vmul.f32 %v1209_v39, %v556_v60  ;;  %v559_v30 = vmul.f32 %v1218_v48, %v557_v61  ;;  %v558_v9 = vmul.f32 %v556_v60, %v480_v51 }
 0x438   :  { %v563_v63 = vadd.f32 %v562_v62, %v557_v61  ;;  %v560_v7 = vmul.f32 %v559_v30, %v1212_v44 }
 0x43a   :  { %v564_v1 = vmul.f32 %v563_v63, %v1212_v44  ;;  %v561_v10 = vadd.f32 %v560_v7, %v558_v9 }
 0x43c   :  { %v565_v2 = vadd.f32 %v564_v1, %v556_v60 }
 0x43e   :  { %856 = vrcp.f32 %v565_v2 }
 0x44b   :  { %v857_v3 = vpop.eup %856 }
 0x44c   :  { %v567_v4 = vmul.f32 %v857_v3, %v565_v2 }
 0x44e   :  { %v568_v5 = vsub.f32 2.0, %v567_v4 }
 0x450   :  { %v569_v6 = vmul.f32 %v857_v3, %v568_v5 }
 0x452   :  { %v570_v8 = vmul.f32 %v569_v6, %v565_v2 }
 0x454   :  { %v571_v0 = vsub.f32 2.0, %v570_v8 }
 0x456   :  { %v572_v39 = vmul.f32 %v571_v0, %v569_v6 }
 0x458   :  { %v573_v11 = vmul.f32 %v572_v39, %v561_v10 }
 0x45a   :  { %574 = vst [vmem:[#allocation11] sm:$0xff] %v573_v11 }
 0x45b   :  { %969 = shalt.err (!%p966_p1)
}
 0x45c   :  { %584 = dma.vmem_to_hbm [thread:$0]  %s582_s25, 128, %s1280_s6, [#allocation4]  }
 0x45d   :  { %984 = dma.done.wait [#allocation4], 128  }
 0x45e   :  { %985 = vsyncadd [#allocation4], 4294967168 }
 0x45f   :  { %588 = vsyncpa [#allocation3], 1 }
 0x460   :  { %589 = vsyncpa [#allocation6], 1 }
 0x461   :  { %590 = vsyncpa [#allocation9], 1 }
 0x462   :  { %591 = vsyncpa [#allocation4], 1 }

</bundles_post_ra>
